<compile_context>
chip_gen: v7x
topology: tpu7x:2x2x1
jax: 0.10.0
libtpu: 0.0.40
codegen_flags: <defaults>
</compile_context>

<pallas_src>
from functools import lru_cache, partial

import numpy as np

import jax
import jax.numpy as jnp
from jax import lax
from jax.experimental import pallas as pl
from jax.experimental.pallas import tpu as pltpu


def _round_up(n, m):
    return ((n + m - 1) // m) * m


def _cdiv(a, b):
    return -(-a // b)


@lru_cache(maxsize=None)
def _vmem_limit_bytes():
    """Scoped-VMEM limit for this chip generation (trace-time query)."""
    cap = 64 * 1024 * 1024  # conservative fallback (v7x per-TC physical)
    try:
        info = pltpu.get_tpu_info()
        cap = int(getattr(info, "vmem_capacity_bytes", cap))
    except Exception:
        pass
    # Leave headroom for compiler-internal scratch; cap at 100 MiB.
    # v5e/v6e (128 MiB) -> 96 MiB; v7x (64 MiB/TC) -> 48 MiB.
    return min(cap * 3 // 4, 100 * 1024 * 1024)


# --------- single-shot kernel: whole (padded) problem, one MXU pass, no grid ---------
def _linear_single_kernel(x_ref, w_ref, o_ref):
    # Contract dim 1 of x (B, K) with dim 1 of w (N, K) -> (B, N) == x @ w.T
    o_ref[...] = lax.dot_general(
        x_ref[...],
        w_ref[...],
        dimension_numbers=(((1,), (1,)), ((), ())),
        preferred_element_type=jnp.float32,
    ).astype(o_ref.dtype)


# --------- tiled kernel: (M, N, K) grid, accumulate directly into the f32 output -----
def _linear_tiled_kernel(x_ref, w_ref, o_ref):
    part = lax.dot_general(
        x_ref[...],
        w_ref[...],
        dimension_numbers=(((1,), (1,)), ((), ())),
        preferred_element_type=jnp.float32,
    )

    @pl.when(pl.program_id(2) == 0)
    def _():
        o_ref[...] = part

    @pl.when(pl.program_id(2) != 0)
    def _():
        o_ref[...] += part


def _choose_tile(dim, cap, align):
    """Largest tile (multiple of `align`, <= cap) minimizing total padded size."""
    if dim <= cap:
        return dim
    best_t = align
    best_total = _cdiv(dim, best_t) * best_t
    t = (cap // align) * align
    while t >= align:
        total = _cdiv(dim, t) * t
        if total < best_total or (total == best_total and t > best_t):
            best_t, best_total = t, total
        t -= align
    return best_t


def _select_tiles(Bp, Np, Kp, in_itemsize, budget, sub):
    """Pick (tm, tn, tk) for the M/N/K-tiled path.

    Tiles are sized as large as the per-generation VMEM budget allows (measured
    HBM-roofline fraction scales strongly with tile size).  tm covers the whole
    batch when it fits so the weight is streamed from HBM only once.
    """
    tm_cap = Bp if Bp <= 1024 else 512
    tn_cap, tk_cap = 512, 2048

    def ws(tm, tn, tk):
        # double-buffered inputs + double-buffered f32 output block
        return 2 * (tm + tn) * tk * in_itemsize + 2 * tm * tn * 4

    while True:
        tm = _choose_tile(Bp, tm_cap, sub)
        tn = _choose_tile(Np, tn_cap, 128)
        tk = _choose_tile(Kp, tk_cap, 128)
        at_floor = tk_cap <= 512 and tm_cap <= 256 and tn_cap <= 256
        if ws(tm, tn, tk) <= budget or at_floor:
            return tm, tn, tk
        if tk_cap > 512:
            tk_cap //= 2
        elif tm_cap > 256:
            tm_cap = max(256, tm_cap // 2)
        else:
            tn_cap = max(256, tn_cap // 2)


@partial(jax.jit, static_argnames=("compute_dtype",))
def slpnet_forward(x, weight, compute_dtype=None):
    """y = x @ weight.T  (nn.Linear forward, bias=False).

    x:      (B, D_in)
    weight: (D_out, D_in)   native PyTorch layout (never transposed)
    compute_dtype: None (= x.dtype) / jnp.float32 / jnp.bfloat16.  bf16
        operands halve HBM traffic on this memory-bound op; the MXU still
        accumulates in f32 and the result is returned as f32.
    returns (B, D_out) float32
    """
    B, D_in = x.shape
    D_out, D_in_w = weight.shape
    assert D_in == D_in_w, "x / weight feature-dimension mismatch"

    cdt = np.dtype(compute_dtype) if compute_dtype is not None else np.dtype(x.dtype)
    if cdt not in (np.dtype(jnp.float32), np.dtype(jnp.bfloat16)):
        cdt = np.dtype(jnp.float32)
    isz = cdt.itemsize
    sub = 16 if isz == 2 else 8  # bf16 packs two rows per sublane

    vmem_limit = _vmem_limit_bytes()

    # (sublane, lane)-aligned logical dims.
    Bp = _round_up(B, sub)
    Np = _round_up(D_out, 128)
    Kp = _round_up(D_in, 128)

    total_bytes = (Bp + Np) * Kp * isz + Bp * Np * 4
    single_budget = min(vmem_limit // 4, 12 * 1024 * 1024)

    if total_bytes <= single_budget:
        # ---- one gridless MXU pass: no pipeline prologue/epilogue, no grid steps ----
        x_p = x.astype(cdt)
        if (Bp, Kp) != (B, D_in):
            x_p = jnp.pad(x_p, ((0, Bp - B), (0, Kp - D_in)))
        w_p = weight.astype(cdt)
        if (Np, Kp) != (D_out, D_in):
            w_p = jnp.pad(w_p, ((0, Np - D_out), (0, Kp - D_in)))

        out = pl.pallas_call(
            _linear_single_kernel,
            out_shape=jax.ShapeDtypeStruct((Bp, Np), jnp.float32),
            in_specs=[
                pl.BlockSpec((Bp, Kp), lambda: (0, 0)),
                pl.BlockSpec((Np, Kp), lambda: (0, 0)),
            ],
            out_specs=pl.BlockSpec((Bp, Np), lambda: (0, 0)),
            compiler_params=pltpu.CompilerParams(vmem_limit_bytes=vmem_limit),
            cost_estimate=pl.CostEstimate(
                flops=2 * Bp * Np * Kp,
                transcendentals=0,
                bytes_accessed=(Bp + Np) * Kp * isz + Bp * Np * 4,
            ),
        )(x_p, w_p)
        return out[:B, :D_out]

    # ---- M/N/K-tiled accumulator path (large, generation-aware tiles) ----
    tm, tn, tk = _select_tiles(Bp, Np, Kp, isz, int(vmem_limit * 0.85), sub)
    m_tiles, n_tiles, k_tiles = _cdiv(Bp, tm), _cdiv(Np, tn), _cdiv(Kp, tk)

    # v7x has 2 TensorCores sharded over the "parallel" axes: make sure at
    # least one parallel axis has >= 2 blocks when the problem allows it.
    if m_tiles == 1 and n_tiles == 1 and Np >= 256:
        tn = _round_up(_cdiv(Np, 2), 128)
        n_tiles = _cdiv(Np, tn)

    Bp2, Np2, Kp2 = m_tiles * tm, n_tiles * tn, k_tiles * tk

    # Single cast + single pad per operand, straight to the tile-aligned shape.
    x_p = x.astype(cdt)
    if (Bp2, Kp2) != (B, D_in):
        x_p = jnp.pad(x_p, ((0, Bp2 - B), (0, Kp2 - D_in)))
    w_p = weight.astype(cdt)
    if (Np2, Kp2) != (D_out, D_in):
        w_p = jnp.pad(w_p, ((0, Np2 - D_out), (0, Kp2 - D_in)))

    out = pl.pallas_call(
        _linear_tiled_kernel,
        out_shape=jax.ShapeDtypeStruct((Bp2, Np2), jnp.float32),
        grid_spec=pltpu.PrefetchScalarGridSpec(
            num_scalar_prefetch=0,
            grid=(m_tiles, n_tiles, k_tiles),
            in_specs=[
                pl.BlockSpec((tm, tk), lambda i, j, k: (i, k)),
                pl.BlockSpec((tn, tk), lambda i, j, k: (j, k)),
            ],
            out_specs=pl.BlockSpec((tm, tn), lambda i, j, k: (i, j)),
        ),
        compiler_params=pltpu.CompilerParams(
            dimension_semantics=("parallel", "parallel", "arbitrary"),
            vmem_limit_bytes=vmem_limit,
        ),
        cost_estimate=pl.CostEstimate(
            flops=2 * Bp2 * Np2 * Kp2,
            transcendentals=0,
            bytes_accessed=(n_tiles * Bp2 + m_tiles * Np2) * Kp2 * isz
            + Bp2 * Np2 * 4,
        ),
    )(x_p, w_p)
    return out[:B, :D_out]


if __name__ == "__main__":
    key = jax.random.PRNGKey(0)
    kx, kw, kx2, kw2 = jax.random.split(key, 4)

    # --- small shapes implied by SLPNet(input_size, output_size) ---
    B, D_IN, D_OUT = 8, 32, 4
    x = jax.random.normal(kx, (B, D_IN), dtype=jnp.float32)
    # nn.init.normal_(weight, 0.0, 1.0) -> standard-normal weights, deterministic here.
    weight = jax.random.normal(kw, (D_OUT, D_IN), dtype=jnp.float32)
    y_ref = x @ weight.T

    # f32 path (exact module semantics) -> single-shot gridless kernel.
    y = jax.block_until_ready(slpnet_forward(x, weight))
    assert y.shape == (B, D_OUT)
    assert jnp.allclose(y, y_ref, atol=1e-4, rtol=1e-4)

    # bf16-operand path (f32 accumulation / f32 output): biggest perf lever.
    y_bf16 = jax.block_until_ready(
        slpnet_forward(x, weight, compute_dtype=jnp.bfloat16)
    )
    assert y_bf16.shape == (B, D_OUT)
    assert jnp.allclose(y_bf16, y_ref, atol=0.25, rtol=5e-2)

    # Larger shapes to exercise the tiled M/N/K path (multi-tile N, multi-step K).
    B2, D_IN2, D_OUT2 = 512, 4096, 1024
    x2 = jax.random.normal(kx2, (B2, D_IN2), dtype=jnp.float32)
    w2 = jax.random.normal(kw2, (D_OUT2, D_IN2), dtype=jnp.float32)
    y2 = jax.block_until_ready(slpnet_forward(x2, w2))
    y2_ref = x2 @ w2.T
    assert y2.shape == (B2, D_OUT2)
    assert jnp.allclose(y2, y2_ref, atol=1.0, rtol=1e-2)

    print("KERNEL_OK")
</pallas_src>

<mosaic_0001>
module attributes {stable_mosaic.version = 11 : i64} {
  func.func @_linear_single_kernel(%arg0: memref<8x128xf32, #tpu.memory_space<vmem>>, %arg1: memref<128x128xf32, #tpu.memory_space<vmem>>, %arg2: memref<8x128xf32, #tpu.memory_space<vmem>>) attributes {dimension_semantics = [], scalar_prefetch = 0 : i64, scratch_operands = 0 : i64, tpu.core_type = #tpu.core_type<tc>} {
    %c0 = arith.constant 0 : index
    %c0_0 = arith.constant 0 : index
    %0 = vector.load %arg0[%c0, %c0_0] : memref<8x128xf32, #tpu.memory_space<vmem>>, vector<8x128xf32>
    %c0_1 = arith.constant 0 : index
    %c0_2 = arith.constant 0 : index
    %1 = vector.load %arg1[%c0_1, %c0_2] : memref<128x128xf32, #tpu.memory_space<vmem>>, vector<128x128xf32>
    %cst = arith.constant dense<0.000000e+00> : vector<8x128xf32>
    %2 = tpu.matmul %0, %1, %cst {dimension_numbers = #tpu.dot_dimension_numbers<[1], [1], [0], [0], [0, 0, 1, 0], [], []>} : vector<8x128xf32>, vector<128x128xf32>, vector<8x128xf32> -> vector<8x128xf32>
    %c0_3 = arith.constant 0 : index
    %c0_4 = arith.constant 0 : index
    %3 = vector.load %arg2[%c0_3, %c0_4] : memref<8x128xf32, #tpu.memory_space<vmem>>, vector<8x128xf32>
    tpu.vector_store %arg2[%c0_3, %c0_4], %2 {strides = array<i32>} : memref<8x128xf32, #tpu.memory_space<vmem>>, vector<8x128xf32>,
    return
  }
}

</mosaic_0001>

<bundles_post_ra>
// kernel: slpnet_forward.1
= control target key start
LH: loop header
LB: loop body
LE: loop exit
PB: predicated region body
PF: predicated region fallthrough
CT: control target
= control target key end

     0   :  { %v182_v0 = vmov 0.0|0.0   ;;  %vm183_vm0 = vmmov 0   ;;  %v184_v3 = vmov 0.0   ;;  %s254_s1 = inlined_call_operand.vmem [shape: f32[128,128], index: 1, kind: input, shape index: {}]   ;;  %s255_s0 = inlined_call_operand.vmem [shape: f32[8,128], index: 0, kind: input, shape index: {}]   ;;  %s256_s2 = inlined_call_operand.vmem [shape: f32[8,128], index: 2, kind: output, shape index: {}]  }
   0x1   :  { %155 = vmatprep.subr.bf16.mxu0 %v182_v0  ;;  %v12_v1 = vld [vmem:[%s254_s1] sm:$0xff]  ;;  %v13_v2 = vld [vmem:[%s254_s1 + $0x8] sm:$0xff]  ;;  %152 = vmatprep.mubr.msk.f32.mxu0 %vm183_vm0, %v184_v3  ;;  %v14_v5 = vld [vmem:[%s254_s1 + $0x10] sm:$0xff] }
   0x2   :  { %v156_v4 = vpack.c.bf16 %v13_v2, %v12_v1  ;;  %v15_v6 = vld [vmem:[%s254_s1 + $0x18] sm:$0xff]  ;;  %v16_v8 = vld [vmem:[%s254_s1 + $0x20] sm:$0xff]  ;;  %v17_v9 = vld [vmem:[%s254_s1 + $0x28] sm:$0xff] }
   0x3   :  { %v159_v7 = vpack.c.bf16 %v15_v6, %v14_v5  ;;  %v162_v10 = vpack.c.bf16 %v17_v9, %v16_v8  ;;  %v18_v11 = vld [vmem:[%s254_s1 + $0x30] sm:$0xff]  ;;  %v19_v12 = vld [vmem:[%s254_s1 + $0x38] sm:$0xff]  ;;  %v20_v14 = vld [vmem:[%s254_s1 + $0x40] sm:$0xff] }
   0x4   :  { %157 = vmatpush3.bf16.xpose.msra.mxu0 %v156_v4  ;;  %v165_v13 = vpack.c.bf16 %v19_v12, %v18_v11  ;;  %v21_v15 = vld [vmem:[%s254_s1 + $0x48] sm:$0xff]  ;;  %v22_v17 = vld [vmem:[%s254_s1 + $0x50] sm:$0xff]  ;;  %v23_v18 = vld [vmem:[%s254_s1 + $0x58] sm:$0xff] }
   0x5   :  { %158 = vmatprep.subr.bf16.mxu0 %v182_v0  ;;  %v168_v16 = vpack.c.bf16 %v21_v15, %v20_v14  ;;  %v171_v19 = vpack.c.bf16 %v23_v18, %v22_v17  ;;  %v24_v20 = vld [vmem:[%s254_s1 + $0x60] sm:$0xff]  ;;  %v25_v21 = vld [vmem:[%s254_s1 + $0x68] sm:$0xff]  ;;  %v26_v23 = vld [vmem:[%s254_s1 + $0x70] sm:$0xff] }
   0x6   :  { %v174_v22 = vpack.c.bf16 %v25_v21, %v24_v20  ;;  %v27_v24 = vld [vmem:[%s254_s1 + $0x78] sm:$0xff]  ;;  %v11_v26 = vld [vmem:[%s255_s0] sm:$0xff] }
   0x7   :  { %v177_v25 = vpack.c.bf16 %v27_v24, %v26_v23 }
   0xc   :  { %160 = vmatpush3.bf16.xpose.msra.mxu0 %v159_v7 }
   0xd   :  { %161 = vmatprep.subr.bf16.mxu0 %v182_v0 }
  0x14   :  { %163 = vmatpush3.bf16.xpose.msra.mxu0 %v162_v10 }
  0x15   :  { %164 = vmatprep.subr.bf16.mxu0 %v182_v0 }
  0x1c   :  { %166 = vmatpush3.bf16.xpose.msra.mxu0 %v165_v13 }
  0x1d   :  { %167 = vmatprep.subr.bf16.mxu0 %v182_v0 }
  0x24   :  { %169 = vmatpush3.bf16.xpose.msra.mxu0 %v168_v16 }
  0x25   :  { %170 = vmatprep.subr.bf16.mxu0 %v182_v0 }
  0x2c   :  { %172 = vmatpush3.bf16.xpose.msra.mxu0 %v171_v19 }
  0x2d   :  { %173 = vmatprep.subr.bf16.mxu0 %v182_v0 }
  0x34   :  { %175 = vmatpush3.bf16.xpose.msra.mxu0 %v174_v22 }
  0x35   :  { %176 = vmatprep.subr.bf16.mxu0 %v182_v0 }
  0x3c   :  { %178 = vmatpush3.bf16.xpose.msra.mxu0 %v177_v25 }
  0x43   :  { %153 = vmatmul.mubr.f32.vlgmr.msra.gmra.mrb[0].mxu0 %v11_v26 }
 0x116   :  { %v94_v27 = vpop.f32.mrb[0].mxu0 }
 0x117   :  { %98 = vst [vmem:[%s256_s2] sm:$0xff] %v94_v27  ;;  %v154_v28 = vpop.f32.mrb[1].mxu0 }

</bundles_post_ra>
